<compile_context>
chip_gen: v7x
topology: tpu7x:2x2x1
jax: 0.10.0
libtpu: 0.0.40
codegen_flags: <defaults>
</compile_context>

<pallas_src>
import jax
import jax.numpy as jnp
from jax.experimental import pallas as pl
from jax.experimental.pallas import tpu as pltpu


def _sigmoid(z):
    # exp goes to the EUP slot; the divide is a few VALU ops and is not on the
    # critical path (kernel is MXU / adj-DMA bound).
    return 1.0 / (1.0 + jnp.exp(-z))


def _make_kernel(bt, num_node, node_dim, num_rel, num_bases, out_pad,
                 use_input_linear):
    f32 = jnp.float32

    def kernel(nf_ref, rf_ref, adj_ref, wbn_ref, wbr_ref, ww_ref, b_ref,
               whw_ref, bhw_ref, *rest):
        if use_input_linear:
            win_ref, bin_ref, o_ref = rest
        else:
            (o_ref,) = rest

        wbr = wbr_ref[...]                        # (R, rel_dim, nb), f32

        # ---- relation-typed graph conv fused with the bottleneck ----
        #   h_b = A_cat @ Y_cat
        #   A_cat = [adj_0 | ... | adj_{R-1}]                       (N, R*N)
        #   Y_cat = stack_r( nf @ Wn_r + 1 ⊗ (rf_r @ Wr_r) )        (R*N, nb)
        # One MXU matmul (K = R*N) per batch element replaces R small ones.
        h_parts = []
        for lb in range(bt):                      # bt is small & static
            nf_b = nf_ref[lb].astype(f32)         # (N, node_dim)
            rf_b = rf_ref[lb].astype(f32)         # (R, rel_dim, 1)
            a_b = adj_ref[lb].astype(f32)         # (N, R*N) (bf16 in HBM)

            # All relation vectors at once on the VPU (no M=1 MXU matmuls):
            #   vecs[r, 0, k] = sum_e rf[r, e] * Wr_r[e, k]
            vecs = jnp.sum(rf_b * wbr, axis=1, keepdims=True)     # (R, 1, nb)

            # TODO(synk): if num_rel ever gets large, replace this static
            # unroll by a fori_loop writing into a VMEM scratch Y buffer.
            y_parts = [
                jnp.dot(nf_b, wbn_ref[r], preferred_element_type=f32) + vecs[r]
                for r in range(num_rel)
            ]
            y_cat = jnp.concatenate(y_parts, axis=0)               # (R*N, nb)
            h_parts.append(jnp.dot(a_b, y_cat, preferred_element_type=f32))

        h = h_parts[0] if bt == 1 else jnp.concatenate(h_parts, axis=0)
        nf_all = nf_ref[...].astype(f32).reshape(bt * num_node, node_dim)

        # ---- dense epilogue on the flattened (bt*N, out_pad) slab ----
        x = _sigmoid(jnp.dot(h, ww_ref[...], preferred_element_type=f32)
                     + b_ref[0, 0])                                # SMEM scalar

        if use_input_linear:
            prev = (jnp.dot(nf_all, win_ref[...], preferred_element_type=f32)
                    + bin_ref[...])
        else:
            prev = nf_all           # node features zero-padded to out_pad

        gate = _sigmoid(jnp.dot(x, whw_ref[...], preferred_element_type=f32)
                        + bhw_ref[...])
        res = gate * x + (1.0 - gate) * prev
        o_ref[...] = res.reshape(bt, num_node, out_pad).astype(o_ref.dtype)

    return kernel


def rgcn_highway_forward(node_features, relation_features, adj, params):
    """
    node_features:     (B, N, node_dim)
    relation_features: (B, R, rel_dim)
    adj:               (B, R, N, N)
    params (PyTorch layouts):
        'bottleneck_w': (num_bases, R*(node_dim+rel_dim))   Linear, no bias
        'weight_w':     (out_dim, num_bases)                Linear, no bias
        'rgcn_bias':    scalar
        'highway_w':    (out_dim, out_dim), 'highway_b': (out_dim,)
        optional 'input_linear_w': (out_dim, node_dim), 'input_linear_b': (out_dim,)
    """
    B, N, node_dim = node_features.shape
    _, R, rel_dim = relation_features.shape
    num_bases, tot = params['bottleneck_w'].shape
    out_dim = params['weight_w'].shape[0]
    cat = node_dim + rel_dim
    assert tot == R * cat

    use_input_linear = 'input_linear_w' in params
    if not use_input_linear:
        assert node_dim == out_dim

    f32 = jnp.float32
    out_pad = ((out_dim + 127) // 128) * 128      # lane-dense output slab
    pad_o = out_pad - out_dim

    # ---- wrapper-side layout plumbing (outside the kernel) ----
    wb = params['bottleneck_w'].astype(f32).reshape(num_bases, R, cat)
    wb_node = jnp.transpose(wb[:, :, :node_dim], (1, 2, 0))   # (R, node_dim, nb)
    wb_rel = jnp.transpose(wb[:, :, node_dim:], (1, 2, 0))    # (R, rel_dim,  nb)
    ww_t = jnp.pad(params['weight_w'].astype(f32).T, ((0, 0), (0, pad_o)))
    rgcn_b = jnp.asarray(params['rgcn_bias'], f32).reshape(1, 1)
    whw_t = jnp.pad(params['highway_w'].astype(f32).T,
                    ((0, pad_o), (0, pad_o)))
    bhw = jnp.pad(params['highway_b'].astype(f32).reshape(1, out_dim),
                  ((0, 0), (0, pad_o)))

    nf_in = node_features
    node_dim_k = node_dim
    if not use_input_linear and pad_o:
        # Identity highway: zero-pad node features (and the node-weight input
        # dim) so `prev` is already lane-dense inside the kernel.
        nf_in = jnp.pad(node_features, ((0, 0), (0, 0), (0, pad_o)))
        wb_node = jnp.pad(wb_node, ((0, 0), (0, pad_o), (0, 0)))
        node_dim_k = out_pad

    # adj laid out as (B, N, R*N): relations concatenated along the
    # contraction axis so the graph conv becomes one matmul. bf16 storage
    # (0/1 entries are exact) halves the dominant HBM stream + VMEM footprint.
    adj_cat = (jnp.transpose(adj, (0, 2, 1, 3))
               .reshape(B, N, R * N).astype(jnp.bfloat16))
    rf_in = relation_features[:, :, :, None]      # (B, R, rel_dim, 1)

    # ---- pick the batch tile: amortize the ~0.35us per-grid-step overhead
    # ---- while the double-buffered streams fit a conservative VMEM budget.
    def stream_bytes(bt):
        return 2 * (bt * N * R * N * 2            # adj (bf16)
                    + bt * N * node_dim_k * 4     # node features
                    + bt * R * rel_dim * 4        # relation features
                    + bt * N * out_pad * 4)       # output slab
    budget = 24 * 1024 * 1024
    bt = 1
    for cand in range(2, min(B, 8) + 1):
        if B % cand == 0 and stream_bytes(cand) <= budget:
            bt = cand
    # TODO(synk): for very large N (R*N^2 overflowing VMEM even at bt=1), add a
    # second "parallel" grid axis tiling the node-row dim of adj_cat / output.

    inputs = [nf_in, rf_in, adj_cat, wb_node, wb_rel, ww_t, rgcn_b, whw_t, bhw]
    in_specs = [
        pl.BlockSpec((bt, N, node_dim_k), lambda g: (g, 0, 0)),
        pl.BlockSpec((bt, R, rel_dim, 1), lambda g: (g, 0, 0, 0)),
        pl.BlockSpec((bt, N, R * N), lambda g: (g, 0, 0)),
        # Weights: constant block index -> fetched once, stay VMEM-resident.
        pl.BlockSpec((R, node_dim_k, num_bases), lambda g: (0, 0, 0)),
        pl.BlockSpec((R, rel_dim, num_bases), lambda g: (0, 0, 0)),
        pl.BlockSpec((num_bases, out_pad), lambda g: (0, 0)),
        pl.BlockSpec(memory_space=pltpu.MemorySpace.SMEM),   # scalar rgcn bias
        pl.BlockSpec((out_pad, out_pad), lambda g: (0, 0)),
        pl.BlockSpec((1, out_pad), lambda g: (0, 0)),
    ]
    if use_input_linear:
        win_t = jnp.pad(params['input_linear_w'].astype(f32).T,
                        ((0, 0), (0, pad_o)))
        bin_ = jnp.pad(params['input_linear_b'].astype(f32).reshape(1, out_dim),
                       ((0, 0), (0, pad_o)))
        inputs += [win_t, bin_]
        in_specs += [
            pl.BlockSpec((node_dim, out_pad), lambda g: (0, 0)),
            pl.BlockSpec((1, out_pad), lambda g: (0, 0)),
        ]

    kernel = _make_kernel(bt, N, node_dim_k, R, num_bases, out_pad,
                          use_input_linear)

    out = pl.pallas_call(
        kernel,
        out_shape=jax.ShapeDtypeStruct((B, N, out_pad), node_features.dtype),
        grid_spec=pltpu.PrefetchScalarGridSpec(
            num_scalar_prefetch=0,
            grid=(B // bt,),
            in_specs=in_specs,
            out_specs=pl.BlockSpec((bt, N, out_pad), lambda g: (g, 0, 0)),
        ),
        compiler_params=pltpu.CompilerParams(
            dimension_semantics=("parallel",),     # batch tiles shard across TCs
            vmem_limit_bytes=40 * 1024 * 1024),
    )(*inputs)
    return out[:, :, :out_dim] if pad_o else out


def rgcn_highway_reference(node_features, relation_features, adj, params):
    """Plain-JAX replica of the PyTorch forward (for checking)."""
    B, N, node_dim = node_features.shape
    _, R, rel_dim = relation_features.shape
    hp = 'highest'
    exp_n = jnp.broadcast_to(node_features[:, None, :, :], (B, R, N, node_dim))
    exp_r = jnp.broadcast_to(relation_features[:, :, None, :], (B, R, N, rel_dim))
    comb = jnp.concatenate([exp_n, exp_r], axis=-1)              # (B,R,N,cat)
    supports = jnp.einsum('brij,brjc->bric', adj, comb, precision=hp)
    supports = supports.transpose(0, 2, 1, 3).reshape(B, N, -1)  # (B,N,R*cat)
    h = jnp.einsum('bnc,kc->bnk', supports, params['bottleneck_w'], precision=hp)
    out = jnp.einsum('bnk,ok->bno', h, params['weight_w'], precision=hp)
    x = jax.nn.sigmoid(out + params['rgcn_bias'])
    if 'input_linear_w' in params:
        prev = (jnp.einsum('bni,oi->bno', node_features,
                           params['input_linear_w'], precision=hp)
                + params['input_linear_b'])
    else:
        prev = node_features
    gate = jax.nn.sigmoid(jnp.einsum('bno,po->bnp', x, params['highway_w'],
                                     precision=hp) + params['highway_b'])
    return gate * x + (1.0 - gate) * prev


if __name__ == "__main__":
    B, N = 2, 16
    node_dim, rel_dim, R = 16, 8, 4
    num_bases, out_dim = 8, 32
    cat = node_dim + rel_dim

    key = jax.random.PRNGKey(0)
    keys = jax.random.split(key, 10)

    nf = jax.random.normal(keys[0], (B, N, node_dim), jnp.float32)
    rf = jax.random.normal(keys[1], (B, R, rel_dim), jnp.float32)
    adj = jax.random.bernoulli(keys[2], 0.3, (B, R, N, N)).astype(jnp.float32)

    params = {
        'bottleneck_w': 0.2 * jax.random.normal(keys[3], (num_bases, R * cat), jnp.float32),
        'weight_w': 0.3 * jax.random.normal(keys[4], (out_dim, num_bases), jnp.float32),
        'rgcn_bias': jnp.float32(0.1),
        'highway_w': 0.3 * jax.random.normal(keys[5], (out_dim, out_dim), jnp.float32),
        'highway_b': 0.1 * jax.random.normal(keys[6], (out_dim,), jnp.float32),
        'input_linear_w': 0.3 * jax.random.normal(keys[7], (out_dim, node_dim), jnp.float32),
        'input_linear_b': 0.1 * jax.random.normal(keys[8], (out_dim,), jnp.float32),
    }

    # Case 1: node_input_dim != out_dim  ->  input_linear highway source.
    out = jax.block_until_ready(rgcn_highway_forward(nf, rf, adj, params))
    ref = rgcn_highway_reference(nf, rf, adj, params)
    assert out.shape == (B, N, out_dim)
    assert jnp.allclose(out, ref, atol=2e-3, rtol=2e-3), (
        f"mismatch vs reference, max abs err "
        f"{float(jnp.max(jnp.abs(out - ref)))}")

    # Case 2: node_input_dim == out_dim  ->  identity highway source.
    node_dim2 = out_dim
    cat2 = node_dim2 + rel_dim
    nf2 = jax.random.normal(keys[9], (B, N, node_dim2), jnp.float32)
    params2 = {
        'bottleneck_w': 0.2 * jax.random.normal(keys[3], (num_bases, R * cat2), jnp.float32),
        'weight_w': params['weight_w'],
        'rgcn_bias': jnp.float32(0.1),
        'highway_w': params['highway_w'],
        'highway_b': params['highway_b'],
    }
    out2 = jax.block_until_ready(rgcn_highway_forward(nf2, rf, adj, params2))
    ref2 = rgcn_highway_reference(nf2, rf, adj, params2)
    assert jnp.allclose(out2, ref2, atol=2e-3, rtol=2e-3), (
        f"mismatch vs reference (identity path), max abs err "
        f"{float(jnp.max(jnp.abs(out2 - ref2)))}")

    print("KERNEL_OK")
</pallas_src>

<mosaic_0001>
module attributes {stable_mosaic.version = 11 : i64} {
  func.func @kernel(%arg0: i32, %arg1: memref<2x16x16xf32, #tpu.memory_space<vmem>>, %arg2: memref<2x4x8x1xf32, #tpu.memory_space<vmem>>, %arg3: memref<2x16x64xbf16, #tpu.memory_space<vmem>>, %arg4: memref<4x16x8xf32, #tpu.memory_space<vmem>>, %arg5: memref<4x8x8xf32, #tpu.memory_space<vmem>>, %arg6: memref<8x128xf32, #tpu.memory_space<vmem>>, %arg7: memref<1x1xf32, #tpu.memory_space<smem>>, %arg8: memref<128x128xf32, #tpu.memory_space<vmem>>, %arg9: memref<1x128xf32, #tpu.memory_space<vmem>>, %arg10: memref<16x128xf32, #tpu.memory_space<vmem>>, %arg11: memref<1x128xf32, #tpu.memory_space<vmem>>, %arg12: memref<2x16x128xf32, #tpu.memory_space<vmem>>) attributes {dimension_semantics = [#tpu.dimension_semantics<parallel>], iteration_bounds = array<i64: 1>, scalar_prefetch = 0 : i64, scratch_operands = 0 : i64, tpu.core_type = #tpu.core_type<tc>, window_params = [{transform_indices = @transform_0, window_bounds = array<i64: 2, 16, 16>}, {transform_indices = @transform_1, window_bounds = array<i64: 2, 4, 8, 1>}, {transform_indices = @transform_2, window_bounds = array<i64: 2, 16, 64>}, {pipeline_mode = #tpu.pipeline_mode<synchronous>, transform_indices = @transform_3, window_bounds = array<i64: 4, 16, 8>}, {pipeline_mode = #tpu.pipeline_mode<synchronous>, transform_indices = @transform_4, window_bounds = array<i64: 4, 8, 8>}, {pipeline_mode = #tpu.pipeline_mode<synchronous>, transform_indices = @transform_5, window_bounds = array<i64: 8, 128>}, {transform_indices = @transform_6, window_bounds = array<i64: 1, 1>}, {pipeline_mode = #tpu.pipeline_mode<synchronous>, transform_indices = @transform_7, window_bounds = array<i64: 128, 128>}, {pipeline_mode = #tpu.pipeline_mode<synchronous>, transform_indices = @transform_8, window_bounds = array<i64: 1, 128>}, {pipeline_mode = #tpu.pipeline_mode<synchronous>, transform_indices = @transform_9, window_bounds = array<i64: 16, 128>}, {pipeline_mode = #tpu.pipeline_mode<synchronous>, transform_indices = @transform_10, window_bounds = array<i64: 1, 128>}, {transform_indices = @transform_11, window_bounds = array<i64: 2, 16, 128>}]} {
    %c0 = arith.constant 0 : index
    %c0_0 = arith.constant 0 : index
    %c0_1 = arith.constant 0 : index
    %0 = vector.load %arg5[%c0, %c0_0, %c0_1] : memref<4x8x8xf32, #tpu.memory_space<vmem>>, vector<4x8x8xf32>
    %c0_2 = arith.constant 0 : index
    %c0_3 = arith.constant 0 : index
    %c0_4 = arith.constant 0 : index
    %1 = vector.load %arg1[%c0_2, %c0_3, %c0_4] : memref<2x16x16xf32, #tpu.memory_space<vmem>>, vector<1x16x16xf32>
    %2 = vector.shape_cast %1 : vector<1x16x16xf32> to vector<16x16xf32>
    %c0_5 = arith.constant 0 : index
    %c0_6 = arith.constant 0 : index
    %c0_7 = arith.constant 0 : index
    %c0_8 = arith.constant 0 : index
    %3 = vector.load %arg2[%c0_5, %c0_6, %c0_7, %c0_8] : memref<2x4x8x1xf32, #tpu.memory_space<vmem>>, vector<1x4x8x1xf32>
    %4 = vector.shape_cast %3 : vector<1x4x8x1xf32> to vector<4x8x1xf32>
    %c0_9 = arith.constant 0 : index
    %c0_10 = arith.constant 0 : index
    %c0_11 = arith.constant 0 : index
    %5 = vector.load %arg3[%c0_9, %c0_10, %c0_11] : memref<2x16x64xbf16, #tpu.memory_space<vmem>>, vector<1x16x64xbf16>
    %6 = vector.shape_cast %5 : vector<1x16x64xbf16> to vector<16x64xbf16>
    %7 = arith.extf %6 : vector<16x64xbf16> to vector<16x64xf32>
    %8 = vector.broadcast %4 : vector<4x8x1xf32> to vector<4x8x8xf32>
    %9 = arith.mulf %8, %0 : vector<4x8x8xf32>
    %cst = arith.constant dense<0.000000e+00> : vector<4x8xf32>
    %10 = vector.multi_reduction <add>, %9, %cst [1] : vector<4x8x8xf32> to vector<4x8xf32>
    %11 = vector.shape_cast %10 : vector<4x8xf32> to vector<4x1x8xf32>
    %c0_12 = arith.constant 0 : index
    %c0_13 = arith.constant 0 : index
    %c0_14 = arith.constant 0 : index
    %12 = vector.load %arg4[%c0_12, %c0_13, %c0_14] : memref<4x16x8xf32, #tpu.memory_space<vmem>>, vector<1x16x8xf32>
    %13 = vector.shape_cast %12 : vector<1x16x8xf32> to vector<16x8xf32>
    %cst_15 = arith.constant dense<0.000000e+00> : vector<16x8xf32>
    %14 = tpu.matmul %2, %13, %cst_15 {dimension_numbers = #tpu.dot_dimension_numbers<[1], [0], [0], [1], [0, 0, 1, 1], [], []>} : vector<16x16xf32>, vector<16x8xf32>, vector<16x8xf32> -> vector<16x8xf32>
    %15 = vector.extract_strided_slice %11 {offsets = [0, 0, 0], sizes = [1, 1, 8], strides = [1, 1, 1]} : vector<4x1x8xf32> to vector<1x1x8xf32>
    %16 = vector.shape_cast %15 : vector<1x1x8xf32> to vector<1x8xf32>
    %17 = vector.broadcast %16 : vector<1x8xf32> to vector<16x8xf32>
    %18 = arith.addf %14, %17 : vector<16x8xf32>
    %c1 = arith.constant 1 : index
    %c0_16 = arith.constant 0 : index
    %c0_17 = arith.constant 0 : index
    %19 = vector.load %arg4[%c1, %c0_16, %c0_17] : memref<4x16x8xf32, #tpu.memory_space<vmem>>, vector<1x16x8xf32>
    %20 = vector.shape_cast %19 : vector<1x16x8xf32> to vector<16x8xf32>
    %cst_18 = arith.constant dense<0.000000e+00> : vector<16x8xf32>
    %21 = tpu.matmul %2, %20, %cst_18 {dimension_numbers = #tpu.dot_dimension_numbers<[1], [0], [0], [1], [0, 0, 1, 1], [], []>} : vector<16x16xf32>, vector<16x8xf32>, vector<16x8xf32> -> vector<16x8xf32>
    %22 = vector.extract_strided_slice %11 {offsets = [1, 0, 0], sizes = [1, 1, 8], strides = [1, 1, 1]} : vector<4x1x8xf32> to vector<1x1x8xf32>
    %23 = vector.shape_cast %22 : vector<1x1x8xf32> to vector<1x8xf32>
    %24 = vector.broadcast %23 : vector<1x8xf32> to vector<16x8xf32>
    %25 = arith.addf %21, %24 : vector<16x8xf32>
    %c2 = arith.constant 2 : index
    %c0_19 = arith.constant 0 : index
    %c0_20 = arith.constant 0 : index
    %26 = vector.load %arg4[%c2, %c0_19, %c0_20] : memref<4x16x8xf32, #tpu.memory_space<vmem>>, vector<1x16x8xf32>
    %27 = vector.shape_cast %26 : vector<1x16x8xf32> to vector<16x8xf32>
    %cst_21 = arith.constant dense<0.000000e+00> : vector<16x8xf32>
    %28 = tpu.matmul %2, %27, %cst_21 {dimension_numbers = #tpu.dot_dimension_numbers<[1], [0], [0], [1], [0, 0, 1, 1], [], []>} : vector<16x16xf32>, vector<16x8xf32>, vector<16x8xf32> -> vector<16x8xf32>
    %29 = vector.extract_strided_slice %11 {offsets = [2, 0, 0], sizes = [1, 1, 8], strides = [1, 1, 1]} : vector<4x1x8xf32> to vector<1x1x8xf32>
    %30 = vector.shape_cast %29 : vector<1x1x8xf32> to vector<1x8xf32>
    %31 = vector.broadcast %30 : vector<1x8xf32> to vector<16x8xf32>
    %32 = arith.addf %28, %31 : vector<16x8xf32>
    %c3 = arith.constant 3 : index
    %c0_22 = arith.constant 0 : index
    %c0_23 = arith.constant 0 : index
    %33 = vector.load %arg4[%c3, %c0_22, %c0_23] : memref<4x16x8xf32, #tpu.memory_space<vmem>>, vector<1x16x8xf32>
    %34 = vector.shape_cast %33 : vector<1x16x8xf32> to vector<16x8xf32>
    %cst_24 = arith.constant dense<0.000000e+00> : vector<16x8xf32>
    %35 = tpu.matmul %2, %34, %cst_24 {dimension_numbers = #tpu.dot_dimension_numbers<[1], [0], [0], [1], [0, 0, 1, 1], [], []>} : vector<16x16xf32>, vector<16x8xf32>, vector<16x8xf32> -> vector<16x8xf32>
    %36 = vector.extract_strided_slice %11 {offsets = [3, 0, 0], sizes = [1, 1, 8], strides = [1, 1, 1]} : vector<4x1x8xf32> to vector<1x1x8xf32>
    %37 = vector.shape_cast %36 : vector<1x1x8xf32> to vector<1x8xf32>
    %38 = vector.broadcast %37 : vector<1x8xf32> to vector<16x8xf32>
    %39 = arith.addf %35, %38 : vector<16x8xf32>
    %40 = tpu.concatenate %18, %25, %32, %39 in 0 : vector<16x8xf32>, vector<16x8xf32>, vector<16x8xf32>, vector<16x8xf32> -> vector<64x8xf32>
    %cst_25 = arith.constant dense<0.000000e+00> : vector<16x8xf32>
    %41 = tpu.matmul %7, %40, %cst_25 {dimension_numbers = #tpu.dot_dimension_numbers<[1], [0], [0], [1], [0, 0, 1, 1], [], []>} : vector<16x64xf32>, vector<64x8xf32>, vector<16x8xf32> -> vector<16x8xf32>
    %c1_26 = arith.constant 1 : index
    %c0_27 = arith.constant 0 : index
    %c0_28 = arith.constant 0 : index
    %42 = vector.load %arg1[%c1_26, %c0_27, %c0_28] : memref<2x16x16xf32, #tpu.memory_space<vmem>>, vector<1x16x16xf32>
    %43 = vector.shape_cast %42 : vector<1x16x16xf32> to vector<16x16xf32>
    %c1_29 = arith.constant 1 : index
    %c0_30 = arith.constant 0 : index
    %c0_31 = arith.constant 0 : index
    %c0_32 = arith.constant 0 : index
    %44 = vector.load %arg2[%c1_29, %c0_30, %c0_31, %c0_32] : memref<2x4x8x1xf32, #tpu.memory_space<vmem>>, vector<1x4x8x1xf32>
    %45 = vector.shape_cast %44 : vector<1x4x8x1xf32> to vector<4x8x1xf32>
    %c1_33 = arith.constant 1 : index
    %c0_34 = arith.constant 0 : index
    %c0_35 = arith.constant 0 : index
    %46 = vector.load %arg3[%c1_33, %c0_34, %c0_35] : memref<2x16x64xbf16, #tpu.memory_space<vmem>>, vector<1x16x64xbf16>
    %47 = vector.shape_cast %46 : vector<1x16x64xbf16> to vector<16x64xbf16>
    %48 = arith.extf %47 : vector<16x64xbf16> to vector<16x64xf32>
    %49 = vector.broadcast %45 : vector<4x8x1xf32> to vector<4x8x8xf32>
    %50 = arith.mulf %49, %0 : vector<4x8x8xf32>
    %cst_36 = arith.constant dense<0.000000e+00> : vector<4x8xf32>
    %51 = vector.multi_reduction <add>, %50, %cst_36 [1] : vector<4x8x8xf32> to vector<4x8xf32>
    %52 = vector.shape_cast %51 : vector<4x8xf32> to vector<4x1x8xf32>
    %c0_37 = arith.constant 0 : index
    %c0_38 = arith.constant 0 : index
    %c0_39 = arith.constant 0 : index
    %53 = vector.load %arg4[%c0_37, %c0_38, %c0_39] : memref<4x16x8xf32, #tpu.memory_space<vmem>>, vector<1x16x8xf32>
    %54 = vector.shape_cast %53 : vector<1x16x8xf32> to vector<16x8xf32>
    %cst_40 = arith.constant dense<0.000000e+00> : vector<16x8xf32>
    %55 = tpu.matmul %43, %54, %cst_40 {dimension_numbers = #tpu.dot_dimension_numbers<[1], [0], [0], [1], [0, 0, 1, 1], [], []>} : vector<16x16xf32>, vector<16x8xf32>, vector<16x8xf32> -> vector<16x8xf32>
    %56 = vector.extract_strided_slice %52 {offsets = [0, 0, 0], sizes = [1, 1, 8], strides = [1, 1, 1]} : vector<4x1x8xf32> to vector<1x1x8xf32>
    %57 = vector.shape_cast %56 : vector<1x1x8xf32> to vector<1x8xf32>
    %58 = vector.broadcast %57 : vector<1x8xf32> to vector<16x8xf32>
    %59 = arith.addf %55, %58 : vector<16x8xf32>
    %c1_41 = arith.constant 1 : index
    %c0_42 = arith.constant 0 : index
    %c0_43 = arith.constant 0 : index
    %60 = vector.load %arg4[%c1_41, %c0_42, %c0_43] : memref<4x16x8xf32, #tpu.memory_space<vmem>>, vector<1x16x8xf32>
    %61 = vector.shape_cast %60 : vector<1x16x8xf32> to vector<16x8xf32>
    %cst_44 = arith.constant dense<0.000000e+00> : vector<16x8xf32>
    %62 = tpu.matmul %43, %61, %cst_44 {dimension_numbers = #tpu.dot_dimension_numbers<[1], [0], [0], [1], [0, 0, 1, 1], [], []>} : vector<16x16xf32>, vector<16x8xf32>, vector<16x8xf32> -> vector<16x8xf32>
    %63 = vector.extract_strided_slice %52 {offsets = [1, 0, 0], sizes = [1, 1, 8], strides = [1, 1, 1]} : vector<4x1x8xf32> to vector<1x1x8xf32>
    %64 = vector.shape_cast %63 : vector<1x1x8xf32> to vector<1x8xf32>
    %65 = vector.broadcast %64 : vector<1x8xf32> to vector<16x8xf32>
    %66 = arith.addf %62, %65 : vector<16x8xf32>
    %c2_45 = arith.constant 2 : index
    %c0_46 = arith.constant 0 : index
    %c0_47 = arith.constant 0 : index
    %67 = vector.load %arg4[%c2_45, %c0_46, %c0_47] : memref<4x16x8xf32, #tpu.memory_space<vmem>>, vector<1x16x8xf32>
    %68 = vector.shape_cast %67 : vector<1x16x8xf32> to vector<16x8xf32>
    %cst_48 = arith.constant dense<0.000000e+00> : vector<16x8xf32>
    %69 = tpu.matmul %43, %68, %cst_48 {dimension_numbers = #tpu.dot_dimension_numbers<[1], [0], [0], [1], [0, 0, 1, 1], [], []>} : vector<16x16xf32>, vector<16x8xf32>, vector<16x8xf32> -> vector<16x8xf32>
    %70 = vector.extract_strided_slice %52 {offsets = [2, 0, 0], sizes = [1, 1, 8], strides = [1, 1, 1]} : vector<4x1x8xf32> to vector<1x1x8xf32>
    %71 = vector.shape_cast %70 : vector<1x1x8xf32> to vector<1x8xf32>
    %72 = vector.broadcast %71 : vector<1x8xf32> to vector<16x8xf32>
    %73 = arith.addf %69, %72 : vector<16x8xf32>
    %c3_49 = arith.constant 3 : index
    %c0_50 = arith.constant 0 : index
    %c0_51 = arith.constant 0 : index
    %74 = vector.load %arg4[%c3_49, %c0_50, %c0_51] : memref<4x16x8xf32, #tpu.memory_space<vmem>>, vector<1x16x8xf32>
    %75 = vector.shape_cast %74 : vector<1x16x8xf32> to vector<16x8xf32>
    %cst_52 = arith.constant dense<0.000000e+00> : vector<16x8xf32>
    %76 = tpu.matmul %43, %75, %cst_52 {dimension_numbers = #tpu.dot_dimension_numbers<[1], [0], [0], [1], [0, 0, 1, 1], [], []>} : vector<16x16xf32>, vector<16x8xf32>, vector<16x8xf32> -> vector<16x8xf32>
    %77 = vector.extract_strided_slice %52 {offsets = [3, 0, 0], sizes = [1, 1, 8], strides = [1, 1, 1]} : vector<4x1x8xf32> to vector<1x1x8xf32>
    %78 = vector.shape_cast %77 : vector<1x1x8xf32> to vector<1x8xf32>
    %79 = vector.broadcast %78 : vector<1x8xf32> to vector<16x8xf32>
    %80 = arith.addf %76, %79 : vector<16x8xf32>
    %81 = tpu.concatenate %59, %66, %73, %80 in 0 : vector<16x8xf32>, vector<16x8xf32>, vector<16x8xf32>, vector<16x8xf32> -> vector<64x8xf32>
    %cst_53 = arith.constant dense<0.000000e+00> : vector<16x8xf32>
    %82 = tpu.matmul %48, %81, %cst_53 {dimension_numbers = #tpu.dot_dimension_numbers<[1], [0], [0], [1], [0, 0, 1, 1], [], []>} : vector<16x64xf32>, vector<64x8xf32>, vector<16x8xf32> -> vector<16x8xf32>
    %83 = tpu.concatenate %41, %82 in 0 : vector<16x8xf32>, vector<16x8xf32> -> vector<32x8xf32>
    %c0_54 = arith.constant 0 : index
    %c0_55 = arith.constant 0 : index
    %c0_56 = arith.constant 0 : index
    %84 = vector.load %arg1[%c0_54, %c0_55, %c0_56] : memref<2x16x16xf32, #tpu.memory_space<vmem>>, vector<2x16x16xf32>
    %85 = vector.shape_cast %84 : vector<2x16x16xf32> to vector<32x16xf32>
    %c0_57 = arith.constant 0 : index
    %c0_58 = arith.constant 0 : index
    %86 = vector.load %arg6[%c0_57, %c0_58] : memref<8x128xf32, #tpu.memory_space<vmem>>, vector<8x128xf32>
    %cst_59 = arith.constant dense<0.000000e+00> : vector<32x128xf32>
    %87 = tpu.matmul %83, %86, %cst_59 {dimension_numbers = #tpu.dot_dimension_numbers<[1], [0], [0], [1], [0, 0, 1, 1], [], []>} : vector<32x8xf32>, vector<8x128xf32>, vector<32x128xf32> -> vector<32x128xf32>
    %c0_60 = arith.constant 0 : index
    %c0_61 = arith.constant 0 : index
    %88 = memref.load %arg7[%c0_60, %c0_61] : memref<1x1xf32, #tpu.memory_space<smem>>
    %89 = vector.broadcast %88 : f32 to vector<32x128xf32>
    %90 = arith.addf %87, %89 : vector<32x128xf32>
    %cst_62 = arith.constant 0.000000e+00 : f32
    %91 = vector.broadcast %cst_62 : f32 to vector<32x128xf32>
    %92 = arith.subf %91, %90 : vector<32x128xf32>
    %93 = math.exp %92 : vector<32x128xf32>
    %cst_63 = arith.constant 1.000000e+00 : f32
    %94 = vector.broadcast %cst_63 : f32 to vector<32x128xf32>
    %95 = arith.addf %94, %93 : vector<32x128xf32>
    %cst_64 = arith.constant 1.000000e+00 : f32
    %96 = vector.broadcast %cst_64 : f32 to vector<32x128xf32>
    %97 = arith.divf %96, %95 : vector<32x128xf32>
    %c0_65 = arith.constant 0 : index
    %c0_66 = arith.constant 0 : index
    %98 = vector.load %arg10[%c0_65, %c0_66] : memref<16x128xf32, #tpu.memory_space<vmem>>, vector<16x128xf32>
    %cst_67 = arith.constant dense<0.000000e+00> : vector<32x128xf32>
    %99 = tpu.matmul %85, %98, %cst_67 {dimension_numbers = #tpu.dot_dimension_numbers<[1], [0], [0], [1], [0, 0, 1, 1], [], []>} : vector<32x16xf32>, vector<16x128xf32>, vector<32x128xf32> -> vector<32x128xf32>
    %c0_68 = arith.constant 0 : index
    %c0_69 = arith.constant 0 : index
    %100 = vector.load %arg11[%c0_68, %c0_69] : memref<1x128xf32, #tpu.memory_space<vmem>>, vector<1x128xf32>
    %101 = vector.broadcast %100 : vector<1x128xf32> to vector<32x128xf32>
    %102 = arith.addf %99, %101 : vector<32x128xf32>
    %c0_70 = arith.constant 0 : index
    %c0_71 = arith.constant 0 : index
    %103 = vector.load %arg8[%c0_70, %c0_71] : memref<128x128xf32, #tpu.memory_space<vmem>>, vector<128x128xf32>
    %cst_72 = arith.constant dense<0.000000e+00> : vector<32x128xf32>
    %104 = tpu.matmul %97, %103, %cst_72 {dimension_numbers = #tpu.dot_dimension_numbers<[1], [0], [0], [1], [0, 0, 1, 1], [], []>} : vector<32x128xf32>, vector<128x128xf32>, vector<32x128xf32> -> vector<32x128xf32>
    %c0_73 = arith.constant 0 : index
    %c0_74 = arith.constant 0 : index
    %105 = vector.load %arg9[%c0_73, %c0_74] : memref<1x128xf32, #tpu.memory_space<vmem>>, vector<1x128xf32>
    %106 = vector.broadcast %105 : vector<1x128xf32> to vector<32x128xf32>
    %107 = arith.addf %104, %106 : vector<32x128xf32>
    %cst_75 = arith.constant 0.000000e+00 : f32
    %108 = vector.broadcast %cst_75 : f32 to vector<32x128xf32>
    %109 = arith.subf %108, %107 : vector<32x128xf32>
    %110 = math.exp %109 : vector<32x128xf32>
    %cst_76 = arith.constant 1.000000e+00 : f32
    %111 = vector.broadcast %cst_76 : f32 to vector<32x128xf32>
    %112 = arith.addf %111, %110 : vector<32x128xf32>
    %cst_77 = arith.constant 1.000000e+00 : f32
    %113 = vector.broadcast %cst_77 : f32 to vector<32x128xf32>
    %114 = arith.divf %113, %112 : vector<32x128xf32>
    %115 = arith.mulf %114, %97 : vector<32x128xf32>
    %cst_78 = arith.constant 1.000000e+00 : f32
    %116 = vector.broadcast %cst_78 : f32 to vector<32x128xf32>
    %117 = arith.subf %116, %114 : vector<32x128xf32>
    %118 = arith.mulf %117, %102 : vector<32x128xf32>
    %119 = arith.addf %115, %118 : vector<32x128xf32>
    %120 = vector.shape_cast %119 : vector<32x128xf32> to vector<2x16x128xf32>
    %c0_79 = arith.constant 0 : index
    %c0_80 = arith.constant 0 : index
    %c0_81 = arith.constant 0 : index
    %121 = vector.load %arg12[%c0_79, %c0_80, %c0_81] : memref<2x16x128xf32, #tpu.memory_space<vmem>>, vector<2x16x128xf32>
    tpu.vector_store %arg12[%c0_79, %c0_80, %c0_81], %120 {strides = array<i32>} : memref<2x16x128xf32, #tpu.memory_space<vmem>>, vector<2x16x128xf32>,
    return
  }
  func.func @transform_0(%arg0: i32) -> (i32, i32, i32) {
    %c0_i32 = arith.constant 0 : i32
    %c0_i32_0 = arith.constant 0 : i32
    %c0_i32_1 = arith.constant 0 : i32
    return %arg0, %c0_i32, %c0_i32_0 : i32, i32, i32
  }
  func.func @transform_1(%arg0: i32) -> (i32, i32, i32, i32) {
    %c0_i32 = arith.constant 0 : i32
    %c0_i32_0 = arith.constant 0 : i32
    %c0_i32_1 = arith.constant 0 : i32
    %c0_i32_2 = arith.constant 0 : i32
    return %arg0, %c0_i32, %c0_i32_0, %c0_i32_1 : i32, i32, i32, i32
  }
  func.func @transform_2(%arg0: i32) -> (i32, i32, i32) {
    %c0_i32 = arith.constant 0 : i32
    %c0_i32_0 = arith.constant 0 : i32
    %c0_i32_1 = arith.constant 0 : i32
    return %arg0, %c0_i32, %c0_i32_0 : i32, i32, i32
  }
  func.func @transform_3(%arg0: i32) -> (i32, i32, i32) {
    %c0_i32 = arith.constant 0 : i32
    %c0_i32_0 = arith.constant 0 : i32
    %c0_i32_1 = arith.constant 0 : i32
    %c0_i32_2 = arith.constant 0 : i32
    return %c0_i32, %c0_i32_0, %c0_i32_1 : i32, i32, i32
  }
  func.func @transform_4(%arg0: i32) -> (i32, i32, i32) {
    %c0_i32 = arith.constant 0 : i32
    %c0_i32_0 = arith.constant 0 : i32
    %c0_i32_1 = arith.constant 0 : i32
    %c0_i32_2 = arith.constant 0 : i32
    return %c0_i32, %c0_i32_0, %c0_i32_1 : i32, i32, i32
  }
  func.func @transform_5(%arg0: i32) -> (i32, i32) {
    %c0_i32 = arith.constant 0 : i32
    %c0_i32_0 = arith.constant 0 : i32
    %c0_i32_1 = arith.constant 0 : i32
    return %c0_i32, %c0_i32_0 : i32, i32
  }
  func.func @transform_6(%arg0: i32) -> (i32, i32) {
    %c0_i32 = arith.constant 0 : i32
    %c0_i32_0 = arith.constant 0 : i32
    %c0_i32_1 = arith.constant 0 : i32
    return %c0_i32, %c0_i32_0 : i32, i32
  }
  func.func @transform_7(%arg0: i32) -> (i32, i32) {
    %c0_i32 = arith.constant 0 : i32
    %c0_i32_0 = arith.constant 0 : i32
    %c0_i32_1 = arith.constant 0 : i32
    return %c0_i32, %c0_i32_0 : i32, i32
  }
  func.func @transform_8(%arg0: i32) -> (i32, i32) {
    %c0_i32 = arith.constant 0 : i32
    %c0_i32_0 = arith.constant 0 : i32
    %c0_i32_1 = arith.constant 0 : i32
    return %c0_i32, %c0_i32_0 : i32, i32
  }
  func.func @transform_9(%arg0: i32) -> (i32, i32) {
    %c0_i32 = arith.constant 0 : i32
    %c0_i32_0 = arith.constant 0 : i32
    %c0_i32_1 = arith.constant 0 : i32
    return %c0_i32, %c0_i32_0 : i32, i32
  }
  func.func @transform_10(%arg0: i32) -> (i32, i32) {
    %c0_i32 = arith.constant 0 : i32
    %c0_i32_0 = arith.constant 0 : i32
    %c0_i32_1 = arith.constant 0 : i32
    return %c0_i32, %c0_i32_0 : i32, i32
  }
  func.func @transform_11(%arg0: i32) -> (i32, i32, i32) {
    %c0_i32 = arith.constant 0 : i32
    %c0_i32_0 = arith.constant 0 : i32
    %c0_i32_1 = arith.constant 0 : i32
    return %arg0, %c0_i32, %c0_i32_0 : i32, i32, i32
  }
}

</mosaic_0001>

<bundles_post_ra>
// kernel: tpu_custom_call.1
= control target key start
LH: loop header
LB: loop body
LE: loop exit
PB: predicated region body
PF: predicated region fallthrough
CT: control target
= control target key end

     0   :  { %17 = vsyncpa [#allocation4], 0  ;;  %s2254_s0 = inlined_call_operand.vmem [shape: f32[2,16,16], index: 0, kind: input, shape index: {}]   ;;  %s2255_s1 = inlined_call_operand.vmem [shape: f32[2,4,8,1], index: 1, kind: input, shape index: {}]   ;;  %s2256_s2 = inlined_call_operand.hbm [shape: bf16[2,16,64], index: 2, kind: input, shape index: {}]   ;;  %s2257_s3 = inlined_call_operand.vmem [shape: f32[4,16,8], index: 3, kind: input, shape index: {}]   ;;  %s2258_s4 = inlined_call_operand.vmem [shape: f32[4,8,8], index: 4, kind: input, shape index: {}]   ;;  %s2259_s5 = inlined_call_operand.hbm [shape: f32[8,128], index: 5, kind: input, shape index: {}]   ;;  %s2260_s6 = inlined_call_operand.<no memory space> [shape: f32[1,1], index: 6, kind: input, shape index: {}]   ;;  %s2261_s7 = inlined_call_operand.vmem [shape: f32[128,128], index: 7, kind: input, shape index: {}]   ;;  %s2262_s8 = inlined_call_operand.vmem [shape: f32[1,128], index: 8, kind: input, shape index: {}]   ;;  %s2263_s9 = inlined_call_operand.hbm [shape: f32[16,128], index: 9, kind: input, shape index: {}]   ;;  %s2264_s10 = inlined_call_operand.vmem [shape: f32[1,128], index: 10, kind: input, shape index: {}]   ;;  %s2265_s11 = inlined_call_operand.hbm [shape: f32[2,16,128], index: 11, kind: output, shape index: {}]  }
   0x1   :  { %18 = vsyncpa [#allocation7], 0 }
   0x2   :  { %19 = vsyncpa [#allocation5], 0  ;;  %s1922_s17 = smov [#allocation6]   ;;  %s1923_s19 = smov [#allocation3]  }
   0x3   :  { %s46_s18 = sshll.u32 %s1922_s17, 4  ;;  %s29_s20 = sshll.u32 %s1923_s19, 4  ;;  %s47_s18 = int_to_ptr.vmem [resolvable:$true] %s46_s18  ;;  %s1991_s20 = int_to_ptr.vmem [resolvable:$true] %s29_s20 }
   0x4   :  { %s1828_s23 = scalar_lea.hbm %s2259_s5, 128 }
   0x5   :  { %p1829_p0 = scmp.ne.s32.totalorder %s2259_s5, %s1828_s23  ;;  %p1832_p1 = scmp.lt.u32.totalorder %s1828_s23, %s2259_s5 }
   0x7   :  { %p1834_p2 = pnand %p1832_p1, %p1829_p0 }
   0x9   :  { %1837 = shalt.err (!%p1834_p2)
}
   0xa   :  { %s1838_s28 = scalar_lea.vmem %s47_s18, 128  ;;  %p1843_p4 = scmp.lt.s32.totalorder %s47_s18, %s47_s18 }
   0xb   :  { %p1839_p3 = scmp.ne.s32.totalorder %s47_s18, %s1838_s28  ;;  %p1844_p5 = scmp.lt.s32.totalorder %s1838_s28, %s1838_s28 }
   0xd   :  { %p1845_p6 = por %p1844_p5, %p1843_p4 }
   0xf   :  { %p1846_p7 = pnand %p1845_p6, %p1839_p3 }
  0x11   :  { %1849 = shalt.err (!%p1846_p7)
}
  0x12   :  { %49 = dma.hbm_to_vmem [thread:$0]  %s2259_s5, 128, %s47_s18, [#allocation7]  }
  0x13   :  { %s1850_s14 = scalar_lea.hbm %s2256_s2, 256 }
  0x14   :  { %p1851_p8 = scmp.ne.s32.totalorder %s2256_s2, %s1850_s14  ;;  %p1854_p9 = scmp.lt.u32.totalorder %s1850_s14, %s2256_s2 }
  0x16   :  { %p1856_p10 = pnand %p1854_p9, %p1851_p8 }
  0x18   :  { %1859 = shalt.err (!%p1856_p10)
}
  0x19   :  { %s1860_s21 = scalar_lea.vmem %s1991_s20, 256  ;;  %p1865_p12 = scmp.lt.s32.totalorder %s1991_s20, %s1991_s20 }
  0x1a   :  { %p1861_p11 = scmp.ne.s32.totalorder %s1991_s20, %s1860_s21  ;;  %p1866_p13 = scmp.lt.s32.totalorder %s1860_s21, %s1860_s21 }
  0x1c   :  { %p1867_p0 = por %p1866_p13, %p1865_p12 }
  0x1e   :  { %p1868_p1 = pnand %p1867_p0, %p1861_p11 }
  0x20   :  { %1871 = shalt.err (!%p1868_p1)
}
  0x21   :  { %s1924_s5 = smov 64   ;;  %s1925_s18 = smov 4  }
  0x22   :  { %35 = dma.hbm_to_vmem [thread:$0]  %s2256_s2, 256, %s1991_s20, [#allocation4], %s1924_s5, %s1924_s5, %s1925_s18  }
  0x23   :  { %s1926_s24 = smov [#allocation8]   ;;  %s1872_s28 = scalar_lea.hbm %s2263_s9, 256 }
  0x24   :  { %s61_s25 = sshll.u32 %s1926_s24, 4  ;;  %p1873_p2 = scmp.ne.s32.totalorder %s2263_s9, %s1872_s28  ;;  %s62_s25 = int_to_ptr.vmem [resolvable:$true] %s61_s25 }
  0x25   :  { %p1876_p3 = scmp.lt.u32.totalorder %s1872_s28, %s2263_s9 }
  0x27   :  { %p1878_p4 = pnand %p1876_p3, %p1873_p2 }
  0x29   :  { %1881 = shalt.err (!%p1878_p4)
}
  0x2a   :  { %s1882_s14 = scalar_lea.vmem %s62_s25, 256  ;;  %p1887_p6 = scmp.lt.s32.totalorder %s62_s25, %s62_s25 }
  0x2b   :  { %p1883_p5 = scmp.ne.s32.totalorder %s62_s25, %s1882_s14  ;;  %p1888_p7 = scmp.lt.s32.totalorder %s1882_s14, %s1882_s14 }
  0x2d   :  { %p1889_p8 = por %p1888_p7, %p1887_p6 }
  0x2f   :  { %p1890_p9 = pnand %p1889_p8, %p1883_p5 }
  0x31   :  { %1893 = shalt.err (!%p1890_p9)
}
  0x32   :  { %s1927_s2 = smov 128   ;;  %s1928_s20 = smov 8  }
  0x33   :  { %67 = dma.hbm_to_vmem [thread:$0]  %s2263_s9, 256, %s62_s25, [#allocation7], %s1927_s2, %s1927_s2, %s1928_s20  }
  0x34   :  { %1916 = dma.done.wait [#allocation4], 256  }
  0x35   :  { %1917 = vsyncadd [#allocation4], 4294967040 }
  0x36   :  { %1918 = dma.done.wait [#allocation7], 384  }
  0x37   :  { %1919 = vsyncadd [#allocation7], 4294966912  ;;  %v1929_v0 = vmov 0   ;;  %vm148_vm0 = vcmask 130048   ;;  %v146_v1 = vld [vmem:[%s2257_s3] sm:$0xff]  ;;  %v147_v2 = vld [vmem:[%s2257_s3 + $0x8] sm:$0xff] }
  0x38   :  { %1794 = vset.pattern.permute.xlu0 %v1929_v0  ;;  %1795 = vset.pattern.permute.xlu1 %v1929_v0  ;;  %v83_v3 = vld [vmem:[%s2254_s0] sm:$0xff]  ;;  %v1685_v4 = vpack.c.bf16 %v147_v2, %v146_v1  ;;  %v2050_v5 = vld [vmem:[%s2254_s0 + $0x10] sm:$0xff]  ;;  %v1405_v7 = vld [vmem:[%s2257_s3 + $0x18] sm:$0xff]  ;;  %vm464_vm1 = vcmask 523264   ;;  %vm117_vm2 = vcmask 64512  }
  0x39   :  { %1539 = vmatprep.mubr.msk.f32.mxu0 %vm148_vm0, %v83_v3  ;;  %v1404_v6 = vld [vmem:[%s2257_s3 + $0x10] sm:$0xff]  ;;  %1586 = vmatprep.mubr.msk.f32.mxu1 %vm148_vm0, %v2050_v5  ;;  %v2063_v8 = vld [vmem:[%s2254_s0 + $0x8] sm:$0xff]  ;;  %v1408_v10 = vld [vmem:[%s2257_s3 + $0x20] sm:$0xff] }
  0x3a   :  { %1686 = vmatprep.subr.bf16.mxu0 %v1685_v4  ;;  %1718 = vmatprep.subr.bf16.mxu1 %v1685_v4  ;;  %v1689_v9 = vpack.c.bf16 %v1405_v7, %v1404_v6  ;;  %v1409_v11 = vld [vmem:[%s2257_s3 + $0x28] sm:$0xff]  ;;  %v2074_v12 = vld [vmem:[%s2254_s0 + $0x18] sm:$0xff]  ;;  %v85_v13 = vld [vmem:[%s2255_s1] sm:$0xff] }
  0x3b   :  { %1688 = vmatpush3.bf16.msra.mxu0 %v1685_v4  ;;  %1720 = vmatpush3.bf16.msra.mxu1 %v1685_v4  ;;  %v87_v14 = vld [vmem:[%s2255_s1 + $0x10] sm:$0xff]  ;;  %v1693_v15 = vpack.c.bf16 %v1409_v11, %v1408_v10  ;;  %v1413_v17 = vld [vmem:[%s2257_s3 + $0x38] sm:$0xff]  ;;  %v86_v19 = vld [vmem:[%s2255_s1 + $0x8] sm:$0xff] }
  0x3c   :  { %1690 = vmatprep.subr.bf16.mxu0 %v1689_v9  ;;  %1722 = vmatprep.subr.bf16.mxu1 %v1689_v9  ;;  %v1412_v16 = vld [vmem:[%s2257_s3 + $0x30] sm:$0xff]  ;;  %v88_v20 = vld [vmem:[%s2255_s1 + $0x18] sm:$0xff]  ;;  %v1420_v21 = vld [vmem:[%s2255_s1 + $0x20] sm:$0xff] }
  0x3d   :  { %95 = vperm.xlu0 %1794, %v85_v13   ;;  %105 = vperm.xlu1 %1795, %v87_v14   ;;  %v1697_v18 = vpack.c.bf16 %v1413_v17, %v1412_v16  ;;  %v1421_v22 = vld [vmem:[%s2255_s1 + $0x28] sm:$0xff]  ;;  %v1422_v23 = vld [vmem:[%s2255_s1 + $0x30] sm:$0xff]  ;;  %v1423_v24 = vld [vmem:[%s2255_s1 + $0x38] sm:$0xff] }
  0x3e   :  { %1540 = vmatmul.mubr.msk.f32.vlgmr.msra.gmra.mrb[0].mxu0 %vm148_vm0, %v2063_v8  ;;  %1587 = vmatmul.mubr.msk.f32.vlgmr.msra.gmra.mrb[0].mxu1 %vm148_vm0, %v2074_v12  ;;  %v2132_v25 = vld [vmem:[#allocation3] sm:$0xff]   ;;  %v80_v35 = vld [vmem:[%s2258_s4 + $0x8] sm:$0xff]  ;;  %v81_v41 = vld [vmem:[%s2258_s4 + $0x10] sm:$0xff] }
  0x3f   :  { %1692 = vmatpush3.bf16.msra.mxu0 %v1689_v9  ;;  %1724 = vmatpush3.bf16.msra.mxu1 %v1689_v9  ;;  %v1446_v26 = vunpack.c.l.bf16 %v2132_v25  ;;  %v79_v31 = vld [vmem:[%s2258_s4] sm:$0xff]  ;;  %v82_v48 = vld [vmem:[%s2258_s4 + $0x18] sm:$0xff] }
  0x40   :  { %1546 = vmatprep.mubr.msk.f32.mxu0 %vm148_vm0, %v83_v3  ;;  %1593 = vmatprep.mubr.msk.f32.mxu1 %vm148_vm0, %v2050_v5 }
  0x41   :  { %1694 = vmatprep.subr.bf16.mxu0 %v1693_v15  ;;  %1726 = vmatprep.subr.bf16.mxu1 %v1693_v15 }
  0x42   :  { %1547 = vmatmul.mubr.msk.f32.vlgmr.msra.gmra.mrb[2].mxu0 %vm148_vm0, %v2063_v8  ;;  %1594 = vmatmul.mubr.msk.f32.vlgmr.msra.gmra.mrb[2].mxu1 %vm148_vm0, %v2074_v12 }
  0x43   :  { %1696 = vmatpush3.bf16.msra.mxu0 %v1693_v15  ;;  %1728 = vmatpush3.bf16.msra.mxu1 %v1693_v15 }
  0x44   :  { %1553 = vmatprep.mubr.msk.f32.mxu0 %vm148_vm0, %v83_v3  ;;  %1600 = vmatprep.mubr.msk.f32.mxu1 %vm148_vm0, %v2050_v5 }
  0x45   :  { %1698 = vmatprep.subr.bf16.mxu0 %v1697_v18  ;;  %1730 = vmatprep.subr.bf16.mxu1 %v1697_v18 }
  0x46   :  { %1554 = vmatmul.mubr.msk.f32.vlgmr.msra.gmra.mrb[4].mxu0 %vm148_vm0, %v2063_v8  ;;  %1601 = vmatmul.mubr.msk.f32.vlgmr.msra.gmra.mrb[4].mxu1 %vm148_vm0, %v2074_v12 }
  0x47   :  { %1700 = vmatpush3.bf16.msra.mxu0 %v1697_v18  ;;  %1732 = vmatpush3.bf16.msra.mxu1 %v1697_v18 }
  0x48   :  { %1560 = vmatprep.mubr.msk.f32.mxu0 %vm148_vm0, %v83_v3  ;;  %1607 = vmatprep.mubr.msk.f32.mxu1 %vm148_vm0, %v2050_v5 }
  0x49   :  { %100 = vperm.xlu0 %1794, %v86_v19   ;;  %110 = vperm.xlu1 %1795, %v88_v20  }
  0x4a   :  { %1561 = vmatmul.mubr.msk.f32.vlgmr.msra.gmra.mrb[6].mxu0 %vm148_vm0, %v2063_v8  ;;  %1608 = vmatmul.mubr.msk.f32.vlgmr.msra.gmra.mrb[6].mxu1 %vm148_vm0, %v2074_v12 }
  0x4b   :  { %1641 = vmatprep.mubr.msk.f32.mxu1 %vm148_vm0, %v83_v3  ;;  %1579 = vmatprep.mubr.msk.f32.mxu0 %vm464_vm1, %v1446_v26 }
  0x4d   :  { %561 = vperm.xlu0 %1794, %v1420_v21   ;;  %566 = vperm.xlu1 %1795, %v1421_v22  }
  0x51   :  { %571 = vperm.xlu0 %1794, %v1422_v23   ;;  %576 = vperm.xlu1 %1795, %v1423_v24  }
  0xbc   :  { %v96_v27 = vpop.permute.xlu0 %95  ;;  %v106_v28 = vpop.permute.xlu1 %105 }
  0xbd   :  { %v113_v32 = vmul.f32 %v96_v27, %v79_v31  ;;  %v115_v45 = vmul.f32 %v106_v28, %v81_v41 }
  0xbf   :  { %v118_v38 = vsel %vm117_vm2, %v113_v32, 0.0  ;;  %v132_v54 = vsel %vm117_vm2, %v115_v45, 0.0 }
  0xc0   :  { %v119_v43 = vrot.slane %v118_v38, 4  ;;  %v133_v61 = vrot.slane %v132_v54, 4 }
  0xc2   :  { %v120_v52 = vadd.f32 %v119_v43, %v118_v38  ;;  %v134_v4 = vadd.f32 %v133_v61, %v132_v54 }
  0xc4   :  { %v121_v60 = vrot.slane %v120_v52, 2  ;;  %v135_v15 = vrot.slane %v134_v4, 2 }
  0xc6   :  { %v122_v7 = vadd.f32 %v121_v60, %v120_v52  ;;  %v136_v26 = vadd.f32 %v135_v15, %v134_v4 }
  0xc8   :  { %v101_v29 = vpop.permute.xlu0 %100  ;;  %v111_v30 = vpop.permute.xlu1 %110  ;;  %v123_v17 = vrot.slane %v122_v7, 1 }
  0xc9   :  { %v114_v39 = vmul.f32 %v101_v29, %v80_v35  ;;  %v116_v56 = vmul.f32 %v111_v30, %v82_v48 }
  0xca   :  { %v124_v24 = vadd.f32 %v123_v17, %v122_v7 }
  0xcb   :  { %v125_v47 = vsel %vm117_vm2, %v114_v39, 0.0  ;;  %v139_v0 = vsel %vm117_vm2, %v116_v56, 0.0 }
  0xcc   :  { %v562_v33 = vpop.permute.xlu0 %561  ;;  %v567_v36 = vpop.permute.xlu1 %566  ;;  %v126_v53 = vrot.slane %v125_v47, 4  ;;  %v140_v6 = vrot.slane %v139_v0, 4 }
  0xcd   :  { %v579_v34 = vmul.f32 %v562_v33, %v79_v31  ;;  %v580_v37 = vmul.f32 %v567_v36, %v80_v35 }
  0xce   :  { %v127_v62 = vadd.f32 %v126_v53, %v125_v47  ;;  %v141_v16 = vadd.f32 %v140_v6, %v139_v0 }
  0xcf   :  { %v583_v40 = vsel %vm117_vm2, %v579_v34, 0.0  ;;  %v590_v44 = vsel %vm117_vm2, %v580_v37, 0.0 }
  0xd0   :  { %v572_v42 = vpop.permute.xlu0 %571  ;;  %v584_v46 = vrot.slane %v583_v40, 4  ;;  %v591_v50 = vrot.slane %v590_v44, 4  ;;  %v577_v51 = vpop.permute.xlu1 %576  ;;  %v128_v9 = vrot.slane %v127_v62, 2  ;;  %v142_v23 = vrot.slane %v141_v16, 2 }
  0xd1   :  { %v581_v49 = vmul.f32 %v572_v42, %v81_v41  ;;  %v582_v58 = vmul.f32 %v577_v51, %v82_v48 }
  0xd2   :  { %v585_v55 = vadd.f32 %v584_v46, %v583_v40  ;;  %v592_v59 = vadd.f32 %v591_v50, %v590_v44  ;;  %v129_v21 = vadd.f32 %v128_v9, %v127_v62  ;;  %v137_v40 = vrot.slane %v136_v26, 1 }
  0xd3   :  { %v597_v57 = vsel %vm117_vm2, %v581_v49, 0.0  ;;  %v604_v2 = vsel %vm117_vm2, %v582_v58, 0.0  ;;  %v143_v43 = vadd.f32 %v142_v23, %v141_v16  ;;  %v1447_v23 = vunpack.c.h.bf16 %v2132_v25  ;;  %v1126_v25 = vld [vmem:[#allocation8] sm:$0xff] }
  0xd4   :  { %v586_v63 = vrot.slane %v585_v55, 2  ;;  %v598_v1 = vrot.slane %v597_v57, 4  ;;  %v593_v3 = vrot.slane %v592_v59, 2  ;;  %v605_v11 = vrot.slane %v604_v2, 4 }
  0xd5   :  { %v130_v29 = vrot.slane %v129_v21, 1 }
  0xd6   :  { %v599_v10 = vadd.f32 %v598_v1, %v597_v57  ;;  %v587_v13 = vadd.f32 %v586_v63, %v585_v55  ;;  %v594_v14 = vadd.f32 %v593_v3, %v592_v59  ;;  %v606_v19 = vadd.f32 %v605_v11, %v604_v2 }
  0xd7   :  { %v131_v41 = vadd.f32 %v130_v29, %v129_v21  ;;  %v138_v55 = vadd.f32 %v137_v40, %v136_v26  ;;  %v144_v57 = vrot.slane %v143_v43, 1  ;;  %v1238_v40 = vld [vmem:[%s2261_s7 + $0x30] sm:$0xff] }
  0xd8   :  { %v600_v18 = vrot.slane %v599_v10, 2  ;;  %v588_v20 = vrot.slane %v587_v13, 1  ;;  %v595_v22 = vrot.slane %v594_v14, 1  ;;  %v607_v27 = vrot.slane %v606_v19, 2 }
  0xd9   :  { %v145_v6 = vadd.f32 %v144_v57, %v143_v43  ;;  %v1240_v43 = vld [vmem:[%s2261_s7 + $0x40] sm:$0xff] }
  0xda   :  { %v589_v28 = vadd.f32 %v588_v20, %v587_v13  ;;  %v601_v30 = vadd.f32 %v600_v18, %v599_v10  ;;  %v596_v37 = vadd.f32 %v595_v22, %v594_v14  ;;  %v608_v44 = vadd.f32 %v607_v27, %v606_v19  ;;  %v1449_v22 = vld [vmem:[#allocation3 + $0x8] sm:$0xff]   ;;  %v1002_v27 = vld [vmem:[#allocation6] sm:$0xff] }
  0xdb   :  { %v1451_v26 = vunpack.c.h.bf16 %v1449_v22 }
  0xdc   :  { %v602_v42 = vrot.slane %v601_v30, 1  ;;  %v609_v58 = vrot.slane %v608_v44, 1 }
  0xde   :  { %v603_v56 = vadd.f32 %v602_v42, %v601_v30  ;;  %v610_v7 = vadd.f32 %v609_v58, %v608_v44  ;;  %v1241_v44 = vld [vmem:[%s2261_s7 + $0x48] sm:$0xff] }
 0x111   :  { %v1541_v31 = vpop.f32.mrb[0].mxu0  ;;  %v1588_v32 = vpop.f32.mrb[0].mxu1 }
 0x112   :  { %v227_v33 = vadd.f32 %v1541_v31, %v124_v24  ;;  %v689_v34 = vadd.f32 %v1588_v32, %v589_v28  ;;  %v221_v35 = vpop.f32.mrb[1].mxu0  ;;  %v683_v36 = vpop.f32.mrb[1].mxu1 }
 0x113   :  { %v222_v38 = vadd.f32 %v221_v35, %v124_v24  ;;  %v684_v39 = vadd.f32 %v683_v36, %v589_v28  ;;  %v1450_v24 = vunpack.c.l.bf16 %v1449_v22  ;;  %v1127_v28 = vld [vmem:[#allocation8 + $0x8] sm:$0xff]  ;;  %v1235_v35 = vld [vmem:[%s2261_s7 + $0x18] sm:$0xff] }
 0x114   :  { %v1749_v29 = vpack.c.bf16 %v1127_v28, %v1126_v25  ;;  %v1443_v25 = vld [vmem:[%s2262_s8] ss:$0 sm:$0xff] }
 0x115   :  { %v1701_v45 = vpack.c.bf16 %v227_v33, %v222_v38  ;;  %v1733_v46 = vpack.c.bf16 %v689_v34, %v684_v39  ;;  %v1548_v47 = vpop.f32.mrb[2].mxu0  ;;  %v1595_v48 = vpop.f32.mrb[2].mxu1  ;;  %v1234_v34 = vld [vmem:[%s2261_s7 + $0x10] sm:$0xff]  ;;  %v1237_v38 = vld [vmem:[%s2261_s7 + $0x28] sm:$0xff] }
 0x116   :  { %v305_v49 = vadd.f32 %v1548_v47, %v131_v41  ;;  %v764_v50 = vadd.f32 %v1595_v48, %v596_v37  ;;  %v299_v51 = vpop.f32.mrb[3].mxu0  ;;  %v758_v52 = vpop.f32.mrb[3].mxu1  ;;  %1750 = vmatprep.subr.bf16.mxu1 %v1749_v29  ;;  %v1757_v36 = vpack.c.bf16 %v1235_v35, %v1234_v34  ;;  %v1243_v47 = vld [vmem:[%s2261_s7 + $0x58] sm:$0xff] }
 0x117   :  { %v300_v53 = vadd.f32 %v299_v51, %v131_v41  ;;  %v759_v54 = vadd.f32 %v758_v52, %v596_v37  ;;  %1702 = vmatprep.subr.bf16.mxu0 %v1701_v45  ;;  %1752 = vmatpush3.bf16.msra.mxu1 %v1749_v29  ;;  %v1236_v37 = vld [vmem:[%s2261_s7 + $0x20] sm:$0xff]  ;;  %v1239_v41 = vld [vmem:[%s2261_s7 + $0x38] sm:$0xff]  ;;  %v1246_v52 = vld [vmem:[%s2261_s7 + $0x70] sm:$0xff] }
 0x118   :  { %1704 = vmatpush3.bf16.msra.mxu0 %v1701_v45  ;;  %v1761_v39 = vpack.c.bf16 %v1237_v38, %v1236_v37  ;;  %v1765_v42 = vpack.c.bf16 %v1239_v41, %v1238_v40  ;;  %v1769_v45 = vpack.c.bf16 %v1241_v44, %v1240_v43 }
 0x119   :  { %v1705_v59 = vpack.c.bf16 %v305_v49, %v300_v53  ;;  %v1737_v60 = vpack.c.bf16 %v764_v50, %v759_v54  ;;  %v1555_v61 = vpop.f32.mrb[4].mxu0  ;;  %v1602_v62 = vpop.f32.mrb[4].mxu1  ;;  %v1244_v49 = vld [vmem:[%s2261_s7 + $0x60] sm:$0xff]  ;;  %v1245_v50 = vld [vmem:[%s2261_s7 + $0x68] sm:$0xff]  ;;  %v1247_v53 = vld [vmem:[%s2261_s7 + $0x78] sm:$0xff] }
 0x11a   :  { %v383_v63 = vadd.f32 %v1555_v61, %v138_v55  ;;  %v839_v0 = vadd.f32 %v1602_v62, %v603_v56  ;;  %v377_v1 = vpop.f32.mrb[5].mxu0  ;;  %v833_v2 = vpop.f32.mrb[5].mxu1  ;;  %1642 = vmatmul.mubr.msk.f32.vlgmr.msra.gmra.mrb[8].mxu1 %vm148_vm0, %v2063_v8  ;;  %v1232_v8 = vld [vmem:[%s2261_s7] sm:$0xff]  ;;  %v1777_v51 = vpack.c.bf16 %v1245_v50, %v1244_v49  ;;  %v1781_v54 = vpack.c.bf16 %v1247_v53, %v1246_v52 }
 0x11b   :  { %v378_v3 = vadd.f32 %v377_v1, %v138_v55  ;;  %v834_v4 = vadd.f32 %v833_v2, %v603_v56  ;;  %1706 = vmatprep.subr.bf16.mxu0 %v1705_v59  ;;  %1644 = vmatprep.mubr.msk.f32.mxu1 %vm148_vm0, %v2050_v5  ;;  %v1233_v5 = vld [vmem:[%s2261_s7 + $0x8] sm:$0xff] }
 0x11c   :  { %1708 = vmatpush3.bf16.msra.mxu0 %v1705_v59  ;;  %v1004_v59 = vstv %s2260_s6 }
 0x11d   :  { %v1709_v9 = vpack.c.bf16 %v383_v63, %v378_v3  ;;  %v1741_v10 = vpack.c.bf16 %v839_v0, %v834_v4  ;;  %v1562_v11 = vpop.f32.mrb[6].mxu0  ;;  %v1609_v13 = vpop.f32.mrb[6].mxu1 }
 0x11e   :  { %v461_v14 = vadd.f32 %v1562_v11, %v145_v6  ;;  %v914_v15 = vadd.f32 %v1609_v13, %v610_v7  ;;  %v455_v16 = vpop.f32.mrb[7].mxu0  ;;  %v908_v17 = vpop.f32.mrb[7].mxu1  ;;  %1645 = vmatmul.mubr.msk.f32.gmra.mrb[10].mxu1 %vm148_vm0, %v2074_v12  ;;  %v1753_v12 = vpack.c.bf16 %v1233_v5, %v1232_v8 }
 0x11f   :  { %v456_v18 = vadd.f32 %v455_v16, %v145_v6  ;;  %v909_v19 = vadd.f32 %v908_v17, %v610_v7  ;;  %1710 = vmatprep.subr.bf16.mxu0 %v1709_v9 }
 0x120   :  { %1712 = vmatpush3.bf16.msra.mxu0 %v1709_v9  ;;  %1754 = vmatprep.subr.bf16.mxu1 %v1753_v12 }
 0x121   :  { %v1713_v20 = vpack.c.bf16 %v461_v14, %v456_v18  ;;  %v1745_v21 = vpack.c.bf16 %v914_v15, %v909_v19  ;;  %1756 = vmatpush3.bf16.msra.mxu1 %v1753_v12 }
 0x122   :  { %1758 = vmatprep.subr.bf16.mxu1 %v1757_v36 }
 0x123   :  { %1714 = vmatprep.subr.bf16.mxu0 %v1713_v20 }
 0x124   :  { %1716 = vmatpush3.bf16.msra.mxu0 %v1713_v20 }
 0x125   :  { %1734 = vmatprep.subr.bf16.mxu0 %v1733_v46  ;;  %1760 = vmatpush3.bf16.msra.mxu1 %v1757_v36 }
 0x126   :  { %1762 = vmatprep.subr.bf16.mxu1 %v1761_v39 }
 0x127   :  { %1580 = vmatmul.mubr.msk.f32.vlgmr.msra.gmra.mrb[8].mxu0 %vm464_vm1, %v1447_v23 }
 0x128   :  { %1736 = vmatpush3.bf16.msra.mxu0 %v1733_v46  ;;  %1626 = vmatprep.mubr.msk.f32.mxu0 %vm464_vm1, %v1450_v24  ;;  %v1242_v46 = vld [vmem:[%s2261_s7 + $0x50] sm:$0xff] }
 0x129   :  { %1738 = vmatprep.subr.bf16.mxu0 %v1737_v60  ;;  %1764 = vmatpush3.bf16.msra.mxu1 %v1761_v39  ;;  %v1773_v48 = vpack.c.bf16 %v1243_v47, %v1242_v46 }
 0x12a   :  { %1766 = vmatprep.subr.bf16.mxu1 %v1765_v42 }
 0x12c   :  { %1740 = vmatpush3.bf16.msra.mxu0 %v1737_v60 }
 0x12d   :  { %1742 = vmatprep.subr.bf16.mxu0 %v1741_v10  ;;  %1768 = vmatpush3.bf16.msra.mxu1 %v1765_v42 }
 0x12e   :  { %1770 = vmatprep.subr.bf16.mxu1 %v1769_v45 }
 0x130   :  { %1744 = vmatpush3.bf16.msra.mxu0 %v1741_v10 }
 0x131   :  { %1746 = vmatprep.subr.bf16.mxu0 %v1745_v21  ;;  %1772 = vmatpush3.bf16.msra.mxu1 %v1769_v45  ;;  %v1438_v45 = vld [vmem:[%s2264_s10] ss:$0 sm:$0xff]  ;;  %s1930_s10 = smov [#allocation9]  }
 0x132   :  { %1774 = vmatprep.subr.bf16.mxu1 %v1773_v48  ;;  %s1389_s29 = sshll.u32 %s1930_s10, 4  ;;  %s1390_s29 = int_to_ptr.vmem [resolvable:$true] %s1389_s29 }
 0x133   :  { %s1894_s30 = scalar_lea.vmem %s1390_s29, 512  ;;  %p1899_p11 = scmp.lt.s32.totalorder %s1390_s29, %s1390_s29 }
 0x134   :  { %1748 = vmatpush3.bf16.msra.mxu0 %v1745_v21  ;;  %p1895_p10 = scmp.ne.s32.totalorder %s1390_s29, %s1894_s30  ;;  %p1900_p12 = scmp.lt.s32.totalorder %s1894_s30, %s1894_s30 }
 0x135   :  { %1629 = vmatprep.subr.mxu0 %v1002_v27  ;;  %1776 = vmatpush3.bf16.msra.mxu1 %v1773_v48 }
 0x136   :  { %1778 = vmatprep.subr.bf16.mxu1 %v1777_v51  ;;  %p1901_p13 = por %p1900_p12, %p1899_p11 }
 0x137   :  { %1627 = vmatmul.mubr.msk.f32.vlgmr.msra.gmra.mrb[10].mxu0 %vm464_vm1, %v1451_v26 }
 0x138   :  { %1630 = vmatpush3.msra.mxu0 %v1002_v27  ;;  %p1902_p0 = pnand %p1901_p13, %p1895_p10 }
 0x139   :  { %1780 = vmatpush3.bf16.msra.mxu1 %v1777_v51 }
 0x13a   :  { %1782 = vmatprep.subr.bf16.mxu1 %v1781_v54 }
 0x13d   :  { %1784 = vmatpush3.bf16.msra.mxu1 %v1781_v54 }
 0x1ed   :  { %v2218_v55 = vpop.f32.mrb[8].mxu1 }
 0x1ee   :  { %v2220_v56 = vpop.f32.mrb[9].mxu1  ;;  %v1219_v48 = vadd.f32 %v2218_v55, %v1438_v45 }
 0x1ef   :  { %v1214_v50 = vadd.f32 %v1438_v45, %v2220_v56 }
 0x1f1   :  { %v2222_v57 = vpop.f32.mrb[10].mxu1 }
 0x1f2   :  { %v2224_v58 = vpop.f32.mrb[11].mxu1 }
 0x1fa   :  { %v1581_v30 = vpop.f32.mrb[8].mxu0 }
 0x1fb   :  { %v537_v31 = vpop.f32.mrb[9].mxu0 }
 0x1fc   :  { %1631 = vmatprep.mubr.msk.f32.mxu0 %vm117_vm2, %v537_v31 }
 0x1fd   :  { %1632 = vmatmul.mubr.msk.f32.vlgmr.msra.gmra.mrb[12].mxu0 %vm117_vm2, %v1581_v30 }
 0x20a   :  { %v1628_v32 = vpop.f32.mrb[10].mxu0 }
 0x20b   :  { %v989_v33 = vpop.f32.mrb[11].mxu0 }
 0x20c   :  { %1634 = vmatprep.mubr.msk.f32.mxu0 %vm117_vm2, %v989_v33 }
 0x20d   :  { %1635 = vmatmul.mubr.msk.f32.gmra.mrb[14].mxu0 %vm117_vm2, %v1628_v32 }
 0x2d0   :  { %v1633_v60 = vpop.f32.mrb[12].mxu0 }
 0x2d1   :  { %v1089_v61 = vadd.f32 %v1633_v60, %v1004_v59  ;;  %v1083_v62 = vpop.f32.mrb[13].mxu0 }
 0x2d2   :  { %v1084_v63 = vadd.f32 %v1083_v62, %v1004_v59 }
 0x2d3   :  { %v1103_v0 = vsub.f32 0.0, %v1089_v61 }
 0x2d4   :  { %v1102_v1 = vsub.f32 0.0, %v1084_v63 }
 0x2d5   :  { %v1108_v2 = vmul.f32 1.442695, %v1103_v0 }
 0x2d6   :  { %v1106_v3 = vmul.f32 1.442695, %v1102_v1 }
 0x2d7   :  { %1796 = vpow2.f32 %v1108_v2 }
 0x2d8   :  { %1798 = vpow2.f32 %v1106_v3  ;;  %v1229_v3 = vadd.f32 %v2222_v57, %v1438_v45 }
 0x2e0   :  { %v1636_v4 = vpop.f32.mrb[14].mxu0 }
 0x2e1   :  { %v1797_v6 = vpop.eup %1796  ;;  %v1099_v7 = vadd.f32 %v1636_v4, %v1004_v59  ;;  %v1093_v9 = vpop.f32.mrb[15].mxu0  ;;  %v1224_v4 = vadd.f32 %v1438_v45, %v2224_v58 }
 0x2e2   :  { %v1799_v10 = vpop.eup %1798  ;;  %v1115_v11 = vadd.f32 1.0, %v1797_v6  ;;  %v1094_v13 = vadd.f32 %v1093_v9, %v1004_v59 }
 0x2e3   :  { %v1114_v14 = vadd.f32 1.0, %v1799_v10  ;;  %v1105_v15 = vsub.f32 0.0, %v1099_v7 }
 0x2e4   :  { %v1104_v16 = vsub.f32 0.0, %v1094_v13 }
 0x2e5   :  { %1800 = vrcp.f32 %v1114_v14  ;;  %v1112_v17 = vmul.f32 1.442695, %v1105_v15 }
 0x2e6   :  { %1802 = vrcp.f32 %v1115_v11  ;;  %v1110_v18 = vmul.f32 1.442695, %v1104_v16 }
 0x2e7   :  { %1804 = vpow2.f32 %v1112_v17 }
 0x2e8   :  { %1806 = vpow2.f32 %v1110_v18 }
 0x2ef   :  { %v1801_v19 = vpop.eup %1800 }
 0x2f0   :  { %v1803_v20 = vpop.eup %1802  ;;  %1679 = vmatprep.mubr.f32.mxu1 %v1801_v19 }
 0x2f1   :  { %v1805_v21 = vpop.eup %1804  ;;  %1680 = vmatmul.mubr.f32.vlgmr.msra.gmra.mrb[12].mxu1 %v1803_v20 }
 0x2f2   :  { %v1807_v22 = vpop.eup %1806  ;;  %v1117_v23 = vadd.f32 1.0, %v1805_v21 }
 0x2f3   :  { %v1116_v24 = vadd.f32 1.0, %v1807_v22 }
 0x2f5   :  { %1808 = vrcp.f32 %v1116_v24 }
 0x2f6   :  { %1810 = vrcp.f32 %v1117_v23 }
 0x2ff   :  { %v1809_v26 = vpop.eup %1808 }
 0x300   :  { %v1811_v27 = vpop.eup %1810  ;;  %1682 = vmatprep.mubr.f32.mxu1 %v1809_v26 }
 0x301   :  { %1683 = vmatmul.mubr.f32.gmra.mrb[14].mxu1 %v1811_v27 }
 0x3c4   :  { %v1681_v28 = vpop.f32.mrb[12].mxu1 }
 0x3c5   :  { %v1327_v29 = vadd.f32 %v1681_v28, %v1443_v25  ;;  %v1321_v30 = vpop.f32.mrb[13].mxu1 }
 0x3c6   :  { %v1322_v31 = vadd.f32 %v1443_v25, %v1321_v30 }
 0x3c7   :  { %v1341_v32 = vsub.f32 0.0, %v1327_v29 }
 0x3c8   :  { %v1340_v33 = vsub.f32 0.0, %v1322_v31 }
 0x3c9   :  { %v1346_v8 = vmul.f32 1.442695, %v1341_v32 }
 0x3ca   :  { %v1344_v5 = vmul.f32 1.442695, %v1340_v33 }
 0x3cb   :  { %1812 = vpow2.f32 %v1346_v8 }
 0x3cc   :  { %1814 = vpow2.f32 %v1344_v5 }
 0x3d4   :  { %v1684_v12 = vpop.f32.mrb[14].mxu1 }
 0x3d5   :  { %v1813_v34 = vpop.eup %1812  ;;  %v1337_v35 = vadd.f32 %v1684_v12, %v1443_v25  ;;  %v1331_v36 = vpop.f32.mrb[15].mxu1 }
 0x3d6   :  { %v1815_v37 = vpop.eup %1814  ;;  %v1353_v38 = vadd.f32 1.0, %v1813_v34  ;;  %v1332_v39 = vadd.f32 %v1443_v25, %v1331_v36 }
 0x3d7   :  { %v1352_v40 = vadd.f32 1.0, %v1815_v37  ;;  %v1343_v41 = vsub.f32 0.0, %v1337_v35 }
 0x3d8   :  { %1816 = vrcp.f32 %v1353_v38  ;;  %v1342_v42 = vsub.f32 0.0, %v1332_v39 }
 0x3d9   :  { %1818 = vrcp.f32 %v1352_v40  ;;  %v1350_v43 = vmul.f32 1.442695, %v1343_v41 }
 0x3da   :  { %v1348_v44 = vmul.f32 1.442695, %v1342_v42 }
 0x3db   :  { %1820 = vpow2.f32 %v1350_v43 }
 0x3dc   :  { %1822 = vpow2.f32 %v1348_v44 }
 0x3e2   :  { %v1817_v46 = vpop.eup %1816 }
 0x3e3   :  { %v1819_v47 = vpop.eup %1818  ;;  %v1369_v49 = vsub.f32 1.0, %v1817_v46  ;;  %v1365_v53 = vmul.f32 %v1817_v46, %v1803_v20 }
 0x3e4   :  { %v1368_v51 = vsub.f32 1.0, %v1819_v47  ;;  %v1364_v61 = vmul.f32 %v1819_v47, %v1801_v19 }
 0x3e5   :  { %v1821_v52 = vpop.eup %1820  ;;  %v1373_v54 = vmul.f32 %v1369_v49, %v1219_v48 }
 0x3e6   :  { %v1823_v59 = vpop.eup %1822  ;;  %v1355_v60 = vadd.f32 1.0, %v1821_v52  ;;  %v1372_v62 = vmul.f32 %v1368_v51, %v1214_v50 }
 0x3e7   :  { %v1354_v63 = vadd.f32 1.0, %v1823_v59  ;;  %v1377_v0 = vadd.f32 %v1373_v54, %v1365_v53 }
 0x3e8   :  { %1824 = vrcp.f32 %v1355_v60  ;;  %v1376_v1 = vadd.f32 %v1372_v62, %v1364_v61 }
 0x3e9   :  { %1826 = vrcp.f32 %v1354_v63  ;;  %1381 = vst [vmem:[#allocation9 + $0x8] sm:$0xff] %v1377_v0 }
 0x3ea   :  { %1380 = vst [vmem:[#allocation9] sm:$0xff] %v1376_v1 }
 0x3f2   :  { %v1825_v2 = vpop.eup %1824 }
 0x3f3   :  { %v1827_v55 = vpop.eup %1826  ;;  %v1371_v56 = vsub.f32 1.0, %v1825_v2  ;;  %v1367_v7 = vmul.f32 %v1825_v2, %v1811_v27 }
 0x3f4   :  { %v1370_v6 = vsub.f32 1.0, %v1827_v55  ;;  %v1366_v10 = vmul.f32 %v1827_v55, %v1809_v26 }
 0x3f5   :  { %v1375_v9 = vmul.f32 %v1371_v56, %v1229_v3 }
 0x3f6   :  { %v1374_v11 = vmul.f32 %v1370_v6, %v1224_v4 }
 0x3f7   :  { %v1379_v13 = vadd.f32 %v1375_v9, %v1367_v7 }
 0x3f8   :  { %v1378_v14 = vadd.f32 %v1374_v11, %v1366_v10 }
 0x3f9   :  { %1383 = vst [vmem:[#allocation9 + $0x18] sm:$0xff] %v1379_v13 }
 0x3fa   :  { %1382 = vst [vmem:[#allocation9 + $0x10] sm:$0xff] %v1378_v14 }
 0x3fb   :  { %1905 = shalt.err (!%p1902_p0)
}
 0x3fc   :  { %s1906_s14 = scalar_lea.hbm %s2265_s11, 512 }
 0x3fd   :  { %p1907_p1 = scmp.ne.s32.totalorder %s2265_s11, %s1906_s14  ;;  %p1910_p2 = scmp.lt.u32.totalorder %s1906_s14, %s2265_s11 }
 0x3ff   :  { %p1912_p3 = pnand %p1910_p2, %p1907_p1 }
 0x401   :  { %1915 = shalt.err (!%p1912_p3)
}
 0x402   :  { %1395 = dma.vmem_to_hbm [thread:$0]  %s1390_s29, 512, %s2265_s11, [#allocation5], %s1927_s2, %s1927_s2, %s1928_s20  }
 0x403   :  { %1920 = dma.done.wait [#allocation5], 512  }
 0x404   :  { %1921 = vsyncadd [#allocation5], 4294966784 }
 0x405   :  { %1399 = vsyncpa [#allocation4], 1 }
 0x406   :  { %1400 = vsyncpa [#allocation7], 1 }
 0x407   :  { %1401 = vsyncpa [#allocation5], 1 }

</bundles_post_ra>
